<compile_context>
chip_gen: v7x
topology: tpu7x:2x2x1
jax: 0.10.0
libtpu: 0.0.40
codegen_flags: <defaults>
</compile_context>

<pallas_src>
import functools
import math

import jax
import jax.numpy as jnp
from jax.experimental import pallas as pl
from jax.experimental.pallas import tpu as pltpu
from jax.scipy.special import erf as _jax_erf  # reference check only


# ----------------------------------------------------------------------------- config


class BertConfig:
    def __init__(self, hidden_size=32, num_attention_heads=4, intermediate_size=64,
                 max_v_len=6, max_t_len=10, layer_norm_eps=1e-12,
                 hidden_dropout_prob=0.1, attention_probs_dropout_prob=0.1):
        self.hidden_size = hidden_size
        self.num_attention_heads = num_attention_heads
        self.intermediate_size = intermediate_size
        self.max_v_len = max_v_len
        self.max_t_len = max_t_len
        self.layer_norm_eps = layer_norm_eps
        self.hidden_dropout_prob = hidden_dropout_prob
        self.attention_probs_dropout_prob = attention_probs_dropout_prob


# ------------------------------------------------------------------- mask construction
# Tiny, one-time mask prep (same semantics as the PyTorch helpers); plain-JAX glue.


def make_shifted_mask(input_mask, max_v_len, max_t_len, memory_len=0):
    bsz, seq_len = input_mask.shape
    assert max_v_len + max_t_len + memory_len == seq_len
    shifted = jnp.zeros((bsz, max_v_len + max_t_len, seq_len), dtype=input_mask.dtype)
    shifted = shifted.at[:, :, :memory_len + max_v_len].set(1)
    tril = jnp.tril(jnp.ones((max_t_len, max_t_len), dtype=input_mask.dtype))
    shifted = shifted.at[:, max_v_len:, memory_len + max_v_len:].set(tril)
    return shifted


def make_pad_shifted_mask(input_mask, max_v_len, max_t_len, memory_len=0):
    shifted = make_shifted_mask(input_mask, max_v_len, max_t_len, memory_len=memory_len)
    return shifted * input_mask[:, None, :]


# ------------------------------------------------------------------------------ kernels

_INV_SQRT2 = 1.0 / math.sqrt(2.0)


def _erf_approx(x):
    # Abramowitz & Stegun 7.1.26, |err| < 1.5e-7; only mul/add/abs/exp/select
    # (all guaranteed Mosaic lowerings) -- used instead of lax.erf.
    a1, a2, a3, a4, a5 = 0.254829592, -0.284496736, 1.421413741, -1.453152027, 1.061405429
    p = 0.3275911
    z = jnp.abs(x)
    t = 1.0 / (1.0 + p * z)
    poly = ((((a5 * t + a4) * t + a3) * t + a2) * t + a1) * t
    y = 1.0 - poly * jnp.exp(-z * z)
    return jnp.where(x >= 0, y, -y)


def _gelu(x):
    # exact-erf GELU, matching the module's gelu() (not the tanh approximation)
    return x * 0.5 * (1.0 + _erf_approx(x * _INV_SQRT2))


def _dense_kernel(x_ref, w_ref, b_ref, o_ref, *, activation):
    # x_ref: (TB, Din), w_ref: (Din, Dout), b_ref: (1, Dout), o_ref: (TB, Dout)
    y = jnp.dot(x_ref[...], w_ref[...], preferred_element_type=jnp.float32)
    y = y + b_ref[...].astype(jnp.float32)
    if activation == "gelu":
        y = _gelu(y)
    o_ref[...] = y.astype(o_ref.dtype)


def _dense_add_ln_kernel(x_ref, w_ref, b_ref, res_ref, g_ref, beta_ref, o_ref, *, eps):
    # dense -> +bias -> +residual -> LayerNorm(gamma, beta); all in f32.
    y = jnp.dot(x_ref[...], w_ref[...], preferred_element_type=jnp.float32)
    y = y + b_ref[...].astype(jnp.float32) + res_ref[...].astype(jnp.float32)
    u = jnp.mean(y, axis=-1, keepdims=True)
    yc = y - u
    var = jnp.mean(yc * yc, axis=-1, keepdims=True)
    nrm = yc * jax.lax.rsqrt(var + eps)
    o_ref[...] = (g_ref[...].astype(jnp.float32) * nrm
                  + beta_ref[...].astype(jnp.float32)).astype(o_ref.dtype)


def _attention_kernel(q_ref, k_ref, v_ref, m_ref, o_ref, *, scale):
    # q/k/v/o: (1, H, L, Dh); m: (1, L, L) additive mask (0 or -10000).
    q = q_ref[0]
    k = k_ref[0]
    v = v_ref[0]
    s = jnp.einsum("hqd,hkd->hqk", q, k, preferred_element_type=jnp.float32) * scale
    s = s + m_ref[0]                                  # (L, L) broadcasts over heads
    s = s - jnp.max(s, axis=-1, keepdims=True)        # numerically stable softmax
    p = jnp.exp(s)
    p = p / jnp.sum(p, axis=-1, keepdims=True)
    # TODO(synk): attention_probs dropout omitted (inference-mode identity).
    ctx = jnp.einsum("hqk,hkd->hqd", p.astype(v.dtype), v,
                     preferred_element_type=jnp.float32)
    o_ref[0] = ctx.astype(o_ref.dtype)


# ----------------------------------------------------------------------------- wrappers


def _round_up(x, m):
    return ((x + m - 1) // m) * m


def _choose_row_tile(rows, target=256):
    """Row tile: multiple of 8, big enough to amortize per-step overhead, and
    (for small problems) split into >= 2 tiles so both v7x TensorCores get work."""
    r8 = _round_up(max(rows, 1), 8)
    if r8 <= 2 * target:
        tiles = 2 if r8 > 8 else 1
        tb = _round_up(pl.cdiv(r8, tiles), 8)
    else:
        tb = target
    return tb, _round_up(rows, tb)


def _pad_rows(x, padded_rows):
    if x.shape[0] == padded_rows:
        return x
    return jnp.pad(x, ((0, padded_rows - x.shape[0]), (0, 0)))


def dense(x2d, w, b, *, activation=None, row_tile=256):
    rows, din = x2d.shape
    dout = w.shape[1]
    tb, padded = _choose_row_tile(rows, row_tile)
    xp = _pad_rows(x2d, padded)
    out = pl.pallas_call(
        functools.partial(_dense_kernel, activation=activation),
        out_shape=jax.ShapeDtypeStruct((padded, dout), x2d.dtype),
        grid_spec=pltpu.PrefetchScalarGridSpec(
            num_scalar_prefetch=0,
            grid=(padded // tb,),
            in_specs=[
                pl.BlockSpec((tb, din), lambda i: (i, 0)),
                pl.BlockSpec((din, dout), lambda i: (0, 0)),   # weights resident
                pl.BlockSpec((1, dout), lambda i: (0, 0)),     # bias resident
            ],
            out_specs=pl.BlockSpec((tb, dout), lambda i: (i, 0)),
        ),
        compiler_params=pltpu.CompilerParams(dimension_semantics=("parallel",)),
    )(xp, w.astype(x2d.dtype), b.reshape(1, dout).astype(x2d.dtype))
    return out[:rows]


def dense_add_layernorm(x2d, w, b, residual2d, gamma, beta, eps, *, row_tile=256):
    rows, din = x2d.shape
    dout = w.shape[1]
    tb, padded = _choose_row_tile(rows, row_tile)
    xp = _pad_rows(x2d, padded)
    rp = _pad_rows(residual2d, padded)
    out = pl.pallas_call(
        functools.partial(_dense_add_ln_kernel, eps=eps),
        out_shape=jax.ShapeDtypeStruct((padded, dout), x2d.dtype),
        grid_spec=pltpu.PrefetchScalarGridSpec(
            num_scalar_prefetch=0,
            grid=(padded // tb,),
            in_specs=[
                pl.BlockSpec((tb, din), lambda i: (i, 0)),
                pl.BlockSpec((din, dout), lambda i: (0, 0)),
                pl.BlockSpec((1, dout), lambda i: (0, 0)),
                pl.BlockSpec((tb, dout), lambda i: (i, 0)),    # residual
                pl.BlockSpec((1, dout), lambda i: (0, 0)),     # gamma
                pl.BlockSpec((1, dout), lambda i: (0, 0)),     # beta
            ],
            out_specs=pl.BlockSpec((tb, dout), lambda i: (i, 0)),
        ),
        compiler_params=pltpu.CompilerParams(dimension_semantics=("parallel",)),
    )(xp, w.astype(x2d.dtype), b.reshape(1, dout).astype(x2d.dtype),
      rp, gamma.reshape(1, dout).astype(x2d.dtype), beta.reshape(1, dout).astype(x2d.dtype))
    return out[:rows]


def attention_core(q4, k4, v4, add_mask):
    n, h, l, dh = q4.shape
    scale = 1.0 / math.sqrt(dh)
    qkv_spec = pl.BlockSpec((1, h, l, dh), lambda i: (i, 0, 0, 0))
    return pl.pallas_call(
        functools.partial(_attention_kernel, scale=scale),
        out_shape=jax.ShapeDtypeStruct((n, h, l, dh), q4.dtype),
        grid_spec=pltpu.PrefetchScalarGridSpec(
            num_scalar_prefetch=0,
            grid=(n,),
            in_specs=[qkv_spec, qkv_spec, qkv_spec,
                      pl.BlockSpec((1, l, l), lambda i: (i, 0, 0))],
            out_specs=qkv_spec,
        ),
        compiler_params=pltpu.CompilerParams(dimension_semantics=("parallel",)),
    )(q4, k4, v4, add_mask.astype(jnp.float32))


# ------------------------------------------------------------------------------- module


class BertLayerNoMemoryPallas:
    """JAX/Pallas port of BertLayerNoMemory (inference forward)."""

    def __init__(self, config, key):
        self.config = config
        D, I = config.hidden_size, config.intermediate_size
        assert D % config.num_attention_heads == 0
        ks = jax.random.split(key, 16)
        w = lambda k, s: 0.02 * jax.random.normal(k, s, jnp.float32)
        self.wq, self.bq = w(ks[0], (D, D)), w(ks[1], (D,))
        self.wk, self.bk = w(ks[2], (D, D)), w(ks[3], (D,))
        self.wv, self.bv = w(ks[4], (D, D)), w(ks[5], (D,))
        self.w_ao, self.b_ao = w(ks[6], (D, D)), w(ks[7], (D,))
        self.w_i, self.b_i = w(ks[8], (D, I)), w(ks[9], (I,))
        self.w_o, self.b_o = w(ks[10], (I, D)), w(ks[11], (D,))
        self.ln1_g = 1.0 + 0.05 * jax.random.normal(ks[12], (D,), jnp.float32)
        self.ln1_b = 0.05 * jax.random.normal(ks[13], (D,), jnp.float32)
        self.ln2_g = 1.0 + 0.05 * jax.random.normal(ks[14], (D,), jnp.float32)
        self.ln2_b = 0.05 * jax.random.normal(ks[15], (D,), jnp.float32)
        # TODO(synk): memory_intermediate exists in the PyTorch module but is unused
        # in forward(); its parameters are omitted here.

    def __call__(self, hidden_states, attention_mask):
        cfg = self.config
        N, L, D = hidden_states.shape
        H = cfg.num_attention_heads
        dh = D // H

        # --- shifted pad mask -> additive mask (plain-JAX glue, tiny) ---
        shifted = make_pad_shifted_mask(attention_mask.astype(jnp.float32),
                                        cfg.max_v_len, cfg.max_t_len)          # (N, L, L)
        add_mask = (1.0 - shifted) * -10000.0

        x2d = hidden_states.reshape(N * L, D)

        # --- BertSelfAttention: fused QKV projection (one matmul) + attention core ---
        w_qkv = jnp.concatenate([self.wq, self.wk, self.wv], axis=1)
        b_qkv = jnp.concatenate([self.bq, self.bk, self.bv], axis=0)
        qkv = dense(x2d, w_qkv, b_qkv)                                          # (N*L, 3D)
        q, k, v = jnp.split(qkv, 3, axis=-1)
        split_heads = lambda t: t.reshape(N, L, H, dh).transpose(0, 2, 1, 3)    # (N,H,L,dh)
        ctx4 = attention_core(split_heads(q), split_heads(k), split_heads(v), add_mask)
        ctx = ctx4.transpose(0, 2, 1, 3).reshape(N * L, D)

        # --- BertSelfOutput: dense + residual + LayerNorm (dropout = identity) ---
        attn_out = dense_add_layernorm(ctx, self.w_ao, self.b_ao, x2d,
                                       self.ln1_g, self.ln1_b, cfg.layer_norm_eps)

        # --- BertIntermediate: dense + exact-erf GELU ---
        inter = dense(attn_out, self.w_i, self.b_i, activation="gelu")

        # --- BertOutput: dense + residual + LayerNorm (dropout = identity) ---
        out = dense_add_layernorm(inter, self.w_o, self.b_o, attn_out,
                                  self.ln2_g, self.ln2_b, cfg.layer_norm_eps)
        return out.reshape(N, L, D)


# -------------------------------------------------------------------- pure-JAX reference


def reference_forward(model, hidden_states, attention_mask):
    cfg = model.config
    N, L, D = hidden_states.shape
    H = cfg.num_attention_heads
    dh = D // H
    x = hidden_states.astype(jnp.float32)
    shifted = make_pad_shifted_mask(attention_mask.astype(jnp.float32),
                                    cfg.max_v_len, cfg.max_t_len)
    amask = (1.0 - shifted)[:, None, :, :] * -10000.0
    lin = lambda t, w, b: t @ w + b
    split = lambda t: t.reshape(N, L, H, dh).transpose(0, 2, 1, 3)
    ql = split(lin(x, model.wq, model.bq))
    kl = split(lin(x, model.wk, model.bk))
    vl = split(lin(x, model.wv, model.bv))
    scores = (ql @ kl.transpose(0, 1, 3, 2)) / math.sqrt(dh) + amask
    probs = jax.nn.softmax(scores, axis=-1)
    ctx = (probs @ vl).transpose(0, 2, 1, 3).reshape(N, L, D)

    def ln(t, g, b):
        u = t.mean(-1, keepdims=True)
        s = ((t - u) ** 2).mean(-1, keepdims=True)
        return g * ((t - u) / jnp.sqrt(s + cfg.layer_norm_eps)) + b

    attn_out = ln(lin(ctx, model.w_ao, model.b_ao) + x, model.ln1_g, model.ln1_b)
    inter = lin(attn_out, model.w_i, model.b_i)
    inter = inter * 0.5 * (1.0 + _jax_erf(inter / math.sqrt(2.0)))
    out = ln(lin(inter, model.w_o, model.b_o) + attn_out, model.ln2_g, model.ln2_b)
    return out


# ----------------------------------------------------------------------------------- main


if __name__ == "__main__":
    key = jax.random.PRNGKey(0)
    cfg = BertConfig(hidden_size=32, num_attention_heads=4, intermediate_size=64,
                     max_v_len=6, max_t_len=10)
    k_param, k_x = jax.random.split(key)
    model = BertLayerNoMemoryPallas(cfg, k_param)

    N = 2
    L = cfg.max_v_len + cfg.max_t_len      # 16
    D = cfg.hidden_size                    # 32
    hidden_states = jax.random.normal(k_x, (N, L, D), dtype=jnp.float32)
    attention_mask = jnp.ones((N, L), dtype=jnp.float32)
    attention_mask = attention_mask.at[1, L - 3:].set(0.0)   # some padded text positions

    out = jax.block_until_ready(model(hidden_states, attention_mask))
    ref = jax.block_until_ready(reference_forward(model, hidden_states, attention_mask))

    assert out.shape == (N, L, D)
    assert bool(jnp.all(jnp.isfinite(out)))
    max_err = float(jnp.max(jnp.abs(out - ref)))
    assert max_err < 2e-4, f"mismatch vs reference: max abs err = {max_err}"
    print("KERNEL_OK")
</pallas_src>

<mosaic_0001>
module attributes {stable_mosaic.version = 11 : i64} {
  func.func @_dense_kernel(%arg0: i32, %arg1: memref<16x32xf32, #tpu.memory_space<vmem>>, %arg2: memref<32x96xf32, #tpu.memory_space<vmem>>, %arg3: memref<1x96xf32, #tpu.memory_space<vmem>>, %arg4: memref<16x96xf32, #tpu.memory_space<vmem>>) attributes {dimension_semantics = [#tpu.dimension_semantics<parallel>], iteration_bounds = array<i64: 2>, scalar_prefetch = 0 : i64, scratch_operands = 0 : i64, tpu.core_type = #tpu.core_type<tc>, window_params = [{transform_indices = @transform_0, window_bounds = array<i64: 16, 32>}, {pipeline_mode = #tpu.pipeline_mode<synchronous>, transform_indices = @transform_1, window_bounds = array<i64: 32, 96>}, {pipeline_mode = #tpu.pipeline_mode<synchronous>, transform_indices = @transform_2, window_bounds = array<i64: 1, 96>}, {transform_indices = @transform_3, window_bounds = array<i64: 16, 96>}]} {
    %c0 = arith.constant 0 : index
    %c0_0 = arith.constant 0 : index
    %0 = vector.load %arg1[%c0, %c0_0] : memref<16x32xf32, #tpu.memory_space<vmem>>, vector<16x32xf32>
    %c0_1 = arith.constant 0 : index
    %c0_2 = arith.constant 0 : index
    %1 = vector.load %arg2[%c0_1, %c0_2] : memref<32x96xf32, #tpu.memory_space<vmem>>, vector<32x96xf32>
    %cst = arith.constant dense<0.000000e+00> : vector<16x96xf32>
    %2 = tpu.matmul %0, %1, %cst {dimension_numbers = #tpu.dot_dimension_numbers<[1], [0], [0], [1], [0, 0, 1, 1], [], []>} : vector<16x32xf32>, vector<32x96xf32>, vector<16x96xf32> -> vector<16x96xf32>
    %c0_3 = arith.constant 0 : index
    %c0_4 = arith.constant 0 : index
    %3 = vector.load %arg3[%c0_3, %c0_4] : memref<1x96xf32, #tpu.memory_space<vmem>>, vector<1x96xf32>
    %4 = vector.broadcast %3 : vector<1x96xf32> to vector<16x96xf32>
    %5 = arith.addf %2, %4 : vector<16x96xf32>
    %c0_5 = arith.constant 0 : index
    %c0_6 = arith.constant 0 : index
    %6 = vector.load %arg4[%c0_5, %c0_6] : memref<16x96xf32, #tpu.memory_space<vmem>>, vector<16x96xf32>
    tpu.vector_store %arg4[%c0_5, %c0_6], %5 {strides = array<i32>} : memref<16x96xf32, #tpu.memory_space<vmem>>, vector<16x96xf32>,
    return
  }
  func.func @transform_0(%arg0: i32) -> (i32, i32) {
    %c0_i32 = arith.constant 0 : i32
    %c0_i32_0 = arith.constant 0 : i32
    return %arg0, %c0_i32 : i32, i32
  }
  func.func @transform_1(%arg0: i32) -> (i32, i32) {
    %c0_i32 = arith.constant 0 : i32
    %c0_i32_0 = arith.constant 0 : i32
    %c0_i32_1 = arith.constant 0 : i32
    return %c0_i32, %c0_i32_0 : i32, i32
  }
  func.func @transform_2(%arg0: i32) -> (i32, i32) {
    %c0_i32 = arith.constant 0 : i32
    %c0_i32_0 = arith.constant 0 : i32
    %c0_i32_1 = arith.constant 0 : i32
    return %c0_i32, %c0_i32_0 : i32, i32
  }
  func.func @transform_3(%arg0: i32) -> (i32, i32) {
    %c0_i32 = arith.constant 0 : i32
    %c0_i32_0 = arith.constant 0 : i32
    return %arg0, %c0_i32 : i32, i32
  }
}

</mosaic_0001>

<bundles_post_ra>
// kernel: tpu_custom_call.1
= control target key start
LH: loop header
LB: loop body
LE: loop exit
PB: predicated region body
PF: predicated region fallthrough
CT: control target
= control target key end

     0   :  { %8 = vsyncpa [#allocation3], 0  ;;  %s875_s0 = inlined_call_operand.hbm [shape: f32[32,32], index: 0, kind: input, shape index: {}]   ;;  %s876_s1 = inlined_call_operand.hbm [shape: f32[32,96], index: 1, kind: input, shape index: {}]   ;;  %s877_s2 = inlined_call_operand.vmem [shape: f32[1,96], index: 2, kind: input, shape index: {}]   ;;  %s878_s3 = inlined_call_operand.hbm [shape: f32[32,96], index: 3, kind: output, shape index: {}]  }
   0x1   :  { %10 = vsyncpa [#allocation3 + $0x1], 0 }
   0x2   :  { %11 = vsyncpa [#allocation6], 0 }
   0x3   :  { %12 = vsyncpa [#allocation4], 0 }
   0x4   :  { %14 = vsyncpa [#allocation4 + $0x1], 0  ;;  %s665_s12 = smov 0   ;;  %s667_s13 = smov 0  }
   0x5   :  { %s669_s14 = smov 0   ;;  %s671_s15 = smov 0  }
   0x6 LB: > { %s686_s16 = sadd.s32 4294967295, %s636_s15   ;;  %s401_s17 = sadd.s32 4294967294, %s636_s15   ;;  %s636_s15 = sphi %s671_s15, %s898_s15   ;;  %s632_s14 = sphi %s669_s14, %s897_s14   ;;  %s628_s13 = sphi %s667_s13, %s896_s13   ;;  %s624_s12 = sphi %s665_s12, %s895_s12  }
   0x7   : > { %p40_p0 = scmp.ne.s32.totalorder %s628_s13, %s624_s12  ;;  %p879_p1 = scmp.eq.s32.totalorder %s686_s16, 0 }
   0x8   : > { %p112_p3 = scmp.eq.s32.totalorder %s401_s17, 1  ;;  %p402_p5 = scmp.ge.s32.totalorder %s636_s15, 1 }
   0x9   : > { %p695_p4 = por %p879_p1, %p40_p0  ;;  %p119_p7 = scmp.lt.s32.totalorder %s636_s15, 3 }
   0xa   : > { %p700_p6 = por %p112_p3, %p40_p0  ;;  %s638_s21 = smov [#allocation5]  }
   0xb   : > { %s882_s18 = scalar_select %p695_p4, 1, 0 }
   0xc   : > { %s883_s19 = scalar_select %p700_p6, 1, 0 }
   0xd   : > { %p705_p8 = pnand %p402_p5, %p119_p7  ;;  %s131_s22 = sshll.u32 %s638_s21, 4  ;;  %s709_s22 = int_to_ptr.vmem [resolvable:$true] %s131_s22 }
   0xe   : > { %s721_s24 = sadd.s32 1, %s636_s15   ;;  %s27_s25 = sadd.s32 1, %s632_s14 }
   0xf   : > { %s884_s20 = scalar_select %p705_p8, 1, 0 }
  0x10   : > { %p455_p9 = pneg %p705_p8  ;;  %s24_s26 = ssub.s32 %s636_s15, %s721_s24 }
  0x11   : > { %s508_s29 = scalar_lea.hbm %s876_s1, 512 }
  0x12   : > { %p716_p11 = pnand %p455_p9, %p879_p1  ;;  %p509_p12 = scmp.ne.s32.totalorder %s876_s1, %s508_s29 }
  0x13   : > { %p515_p5 = scmp.lt.u32.totalorder %s508_s29, %s876_s1 }
  0x14   : > { %p510_p13 = pneg %p716_p11 }
  0x16   : > { %p511_p0 = pnand %p510_p13, %p509_p12 }
  0x18   : > { %p512_p3 = pneg %p511_p0 }
  0x1a   : > { %p517_p7 = pnand %p515_p5, %p512_p3 }
  0x1c   : > { %520 = shalt.err (!%p517_p7)
}
  0x1d   : > { %s521_s7 = scalar_lea.vmem %s709_s22, 512  ;;  %p529_p2 = scmp.lt.s32.totalorder %s709_s22, %s709_s22 }
  0x1e   : > { %p522_p9 = scmp.ne.s32.totalorder %s709_s22, %s521_s7  ;;  %p530_p6 = scmp.lt.s32.totalorder %s521_s7, %s521_s7 }
  0x20   : > { %p524_p10 = pnand %p522_p9, %p510_p13  ;;  %p531_p4 = por %p530_p6, %p529_p2 }
  0x22   : > { %p525_p1 = pneg %p524_p10 }
  0x24   : > { %p532_p8 = pnand %p531_p4, %p525_p1 }
  0x26   : > { %535 = shalt.err (!%p532_p8)
}
  0x27   : > { %s639_s8 = smov 128   ;;  %s640_s9 = smov 8  }
  0x28   : > { %458 = dma.hbm_to_vmem [thread:$0]  (!%p716_p11), %s876_s1, 512, %s709_s22, [#allocation6], %s639_s8, %s639_s8, %s640_s9  }
  0x29   : > { %p25_p1 = scmp.eq.s32.totalorder %s24_s26, 0  ;;  %p34_p2 = scmp.ne.s32.totalorder %s632_s14, %s628_s13 }
  0x2a   : > { %p35_p4 = scmp.eq.s32.totalorder %s636_s15, 0  ;;  %p468_p6 = scmp.lt.s32.totalorder %s636_s15, 2 }
  0x2b   : > { %s755_s17 = scalar_select %p25_p1, %s632_s14, %s27_s25  }
  0x2c   : > { %p36_p8 = por %p35_p4, %p34_p2  ;;  %p886_p10 = scmp.eq.s32.totalorder %s686_s16, 1 }
  0x2d   : > { %s148_s23 = sand.u32 1, %s632_s14   ;;  %s420_s27 = sshll.u32 %s636_s15, 8 }
  0x2e   : > { %p759_p12 = por %p886_p10, %p34_p2  ;;  %s405_s28 = sshll.u32 %s148_s23, 4 }
  0x2f   : > { %s768_s4 = scalar_lea.hbm %s875_s0, %s420_s27  ;;  %s152_s22 = scalar_lea.vmem [#allocation2], %s405_s28 }
  0x30   : > { %s159_s25 = sshll.u32 %s152_s22, 4  ;;  %p770_p11 = pnand %p468_p6, %p36_p8  ;;  %s774_s25 = int_to_ptr.vmem [resolvable:$true] %s159_s25 }
  0x31   : > { %s776_s5 = scalar_lea.sflag [#allocation3], %s148_s23  ;;  %s536_s6 = scalar_lea.hbm %s768_s4, 256 }
  0x32   : > { %p537_p13 = scmp.ne.s32.totalorder %s768_s4, %s536_s6  ;;  %p538_p0 = pneg %p770_p11 }
  0x33   : > { %s541_s11 = scalar_lea.hbm %s875_s0, 512  ;;  %p542_p7 = scmp.lt.u32.totalorder %s768_s4, %s875_s0 }
  0x34   : > { %p539_p3 = pnand %p538_p0, %p537_p13  ;;  %p543_p9 = scmp.lt.u32.totalorder %s541_s11, %s536_s6 }
  0x35   : > { %p545_p2 = scmp.lt.u32.totalorder %s536_s6, %s768_s4 }
  0x36   : > { %p540_p5 = pneg %p539_p3  ;;  %p544_p1 = por %p543_p9, %p542_p7 }
  0x38   : > { %p546_p4 = por %p545_p2, %p544_p1 }
  0x3a   : > { %p547_p6 = pnand %p546_p4, %p540_p5 }
  0x3c   : > { %550 = shalt.err (!%p547_p6)
}
  0x3d   : > { %s551_s23 = scalar_lea.vmem %s774_s25, 256  ;;  %s641_s29 = smov [#allocation2]  }
  0x3e   : > { %p552_p8 = scmp.ne.s32.totalorder %s774_s25, %s551_s23  ;;  %s556_s30 = sshll.u32 %s641_s29, 4  ;;  %s557_s30 = int_to_ptr.vmem [resolvable:$false] %s556_s30 }
  0x3f   : > { %s558_s22 = scalar_lea.vmem %s557_s30, 512  ;;  %p559_p3 = scmp.lt.s32.totalorder %s774_s25, %s557_s30 }
  0x40   : > { %p554_p10 = pnand %p552_p8, %p538_p0  ;;  %p560_p7 = scmp.lt.s32.totalorder %s558_s22, %s551_s23 }
  0x42   : > { %p555_p13 = pneg %p554_p10  ;;  %p561_p9 = por %p560_p7, %p559_p3 }
  0x44   : > { %p562_p1 = pnand %p561_p9, %p555_p13 }
  0x46   : > { %565 = shalt.err (!%p562_p1)
}
  0x47   : > { %462 = dma.hbm_to_vmem [thread:$0]  (!%p770_p11), %s768_s4, 256, %s774_s25, %s776_s5, %s639_s8, %s639_s8, %s640_s9  }
  0x48   : > { %p889_p0 = scmp.ne.s32.totalorder %s884_s20, 0 }
  0x49   : > { %s810_s6 = sand.u32 (!%p889_p0), 1, %s628_s13   ;;  %p890_p5 = scmp.ne.s32.totalorder (!%p889_p0), %s882_s18, 0 }
  0x4a   : > { %171 = sbr.rel (%p889_p0) target bundleno = 326 (0x146), region = 32  ;;  %s409_s7 = sshll.u32 (!%p889_p0), %s810_s6, 4 }
  0x4b   : > { %s174_s10 = scalar_lea.sflag (!%p889_p0), [#allocation3], %s810_s6  ;;  %s177_s11 = scalar_lea.vmem (!%p889_p0), [#allocation2], %s409_s7 }
  0x51   : > { %611 = dma.done.wait (%p890_p5), %s174_s10, 256  }
  0x52   : > { %613 = vsyncadd (%p890_p5), %s174_s10, 4294967040  ;;  %p891_p2 = scmp.eq.s32.totalorder %s686_s16, 0 }
  0x54   : > { %615 = dma.done.wait (%p891_p2), [#allocation6], 512   ;;  %p892_p11 = pmov %p891_p2 }
  0x55   : > { %vm219_vm0 = vcmask 261120   ;;  %v208_v0 = vld [vmem:[#allocation5] sm:$0xff]  ;;  %v209_v1 = vld [vmem:[#allocation5 + $0x8] sm:$0xff]  ;;  %v210_v2 = vld [vmem:[#allocation5 + $0x10] sm:$0xff]  ;;  %s203_s18 = scalar_lea.vmem [#allocation7], %s409_s7  ;;  %s421_s4 = sshll.u32 %s686_s16, 8 }
  0x56   : > { %617 = vsyncadd (%p892_p11), [#allocation6], 4294966784  ;;  %v439_v3 = vpack.c.bf16 %v209_v1, %v208_v0  ;;  %v211_v4 = vld [vmem:[#allocation5 + $0x18] sm:$0xff]  ;;  %v206_v5 = vld [vmem:[%s177_s11] sm:$0xff]  ;;  %s318_s20 = sshll.u32 %s203_s18, 4  ;;  %vm301_vm1 = vcmask 785408   ;;  %s831_s5 = scalar_lea.hbm %s878_s3, %s421_s4  ;;  %s826_s20 = int_to_ptr.vmem [resolvable:$true] %s318_s20 }
  0x57   : > { %v443_v6 = vpack.c.bf16 %v211_v4, %v210_v2  ;;  %436 = vmatprep.mubr.msk.f32.mxu0 %vm219_vm0, %v206_v5  ;;  %v207_v7 = vld [vmem:[%s177_s11 + $0x8] sm:$0xff]  ;;  %v412_v8 = vld [vmem:[%s877_s2] ss:$0 sm:$0xff]  ;;  %s305_s27 = scalar_lea.sflag [#allocation4], %s810_s6  ;;  %s566_s28 = scalar_lea.vmem %s826_s20, 256 }
  0x58   : > { %440 = vmatprep.subr.bf16.mxu0 %v439_v3  ;;  %p567_p4 = scmp.ne.s32.totalorder %s826_s20, %s566_s28  ;;  %s642_s16 = smov [#allocation7]  }
  0x59   : > { %442 = vmatpush3.bf16.msra.mxu0 %v439_v3  ;;  %s570_s23 = sshll.u32 %s642_s16, 4  ;;  %s571_s23 = int_to_ptr.vmem [resolvable:$false] %s570_s23 }
  0x5a   : > { %444 = vmatprep.subr.bf16.mxu0 %v443_v6  ;;  %p568_p6 = pnand %p567_p4, %p759_p12  ;;  %s572_s29 = scalar_lea.vmem %s571_s23, 512 }
  0x5b   : > { %p573_p10 = scmp.lt.s32.totalorder %s826_s20, %s571_s23  ;;  %p574_p13 = scmp.lt.s32.totalorder %s572_s29, %s566_s28 }
  0x5c   : > { %p569_p8 = pneg %p568_p6 }
  0x5d   : > { %446 = vmatpush3.bf16.msra.mxu0 %v443_v6  ;;  %p575_p3 = por %p574_p13, %p573_p10 }
  0x5f   : > { %p576_p7 = pnand %p575_p3, %p569_p8 }
  0x60   : > { %437 = vmatmul.mubr.msk.f32.vlgmr.msra.gmra.mrb[0].mxu0 %vm219_vm0, %v207_v7 }
 0x133   : > { %v438_v9 = vpop.f32.mrb[0].mxu0 }
 0x134   : > { %v298_v10 = vadd.f32 %v438_v9, %v412_v8  ;;  %v292_v11 = vpop.f32.mrb[1].mxu0 }
 0x135   : > { %v293_v12 = vadd.f32 %v412_v8, %v292_v11 }
 0x136   : > { %303 = vst.msk [vmem:[%s203_s18 + $0x8] sm:$0xff] %vm301_vm1, %v298_v10 }
 0x137   : > { %302 = vst.msk [vmem:[%s203_s18] sm:$0xff] %vm301_vm1, %v293_v12 }
 0x138   : > { %579 = shalt.err (!%p576_p7)
}
 0x139   : > { %s580_s30 = scalar_lea.hbm %s831_s5, 256  ;;  %s584_s10 = scalar_lea.hbm %s878_s3, 512 }
 0x13a   : > { %p581_p9 = scmp.ne.s32.totalorder %s831_s5, %s580_s30  ;;  %p585_p5 = scmp.lt.u32.totalorder %s831_s5, %s878_s3 }
 0x13b   : > { %p586_p2 = scmp.lt.u32.totalorder %s584_s10, %s580_s30  ;;  %p588_p4 = scmp.lt.u32.totalorder %s580_s30, %s831_s5 }
 0x13c   : > { %p582_p1 = pnand %p581_p9, %p759_p12 }
 0x13d   : > { %p587_p11 = por %p586_p2, %p585_p5 }
 0x13e   : > { %p583_p0 = pneg %p582_p1 }
 0x13f   : > { %p589_p6 = por %p588_p4, %p587_p11 }
 0x141   : > { %p590_p8 = pnand %p589_p6, %p583_p0 }
 0x143   : > { %593 = shalt.err (!%p590_p8)
}
 0x144   : > { %s643_s8 = smov 128   ;;  %s644_s9 = smov 8  }
 0x145   : > { %453 = dma.vmem_to_hbm [thread:$0]  (%p759_p12), %s826_s20, 256, %s831_s5, %s305_s27, %s643_s8, %s643_s8, %s644_s9  }
 0x146 PF: > { %s333_s4 = sand.u32 1, %s624_s12   ;;  %p893_p10 = scmp.ne.s32.totalorder %s883_s19, 0 }
 0x147   : > { %p894_p13 = scmp.ge.s32.totalorder %s636_s15, 2  ;;  %s334_s25 = scalar_lea.sflag [#allocation4], %s333_s4 }
 0x149   : > { %p464_p3 = pnand %p894_p13, %p893_p10 }
 0x14b   : > { %619 = dma.done.wait (!%p464_p3), %s334_s25, 256  }
 0x14c   : > { %621 = vsyncadd (!%p464_p3), %s334_s25, 4294967040  ;;  %p17_p7 = scmp.ge.s32.totalorder %s721_s24, 4   ;;  %s895_s12 = smov %s628_s13 }
 0x14d   : > { %s896_s13 = smov %s632_s14  ;;  %s897_s14 = smov %s755_s17 }
 0x14e   : > { %s898_s15 = smov %s721_s24  ;;  %19 = sbr.rel (!%p17_p7) target bundleno = 6 (0x6), region = 81 }
 0x155   :  { %339 = vsyncpa [#allocation3], 1 }
 0x156   :  { %341 = vsyncpa [#allocation3 + $0x1], 1 }
 0x157   :  { %342 = vsyncpa [#allocation6], 1 }
 0x158   :  { %343 = vsyncpa [#allocation4], 1 }
 0x159   :  { %345 = vsyncpa [#allocation4 + $0x1], 1 }

</bundles_post_ra>
